<compile_context>
chip_gen: v6e
topology: v6e:2x2x1
jax: 0.10.0
libtpu: 0.0.40
codegen_flags: <defaults>
</compile_context>

<pallas_src>
import functools

import jax
import jax.numpy as jnp
from jax.experimental import pallas as pl
from jax.experimental.pallas import tpu as pltpu


def _gupsample_kernel(x_ref, a_ref, o_ref, *, h, w, cout):
    """One batch sample per grid step.

    x_ref: (1, Cin, H*W)       flattened (lane-dense) input, row-major (H, W)
    a_ref: (4*Cout, 4*Cin)     phase-stacked weights, 4 input shifts fused along K
    o_ref: (1, 4*Cout, H*W)    phase-stacked, normalized + ReLU'd output
    """
    hw = h * w
    x = x_ref[0].astype(jnp.float32)                      # (Cin, HW)

    # Boundary masks (1, HW): shifted taps that fall outside the input are zero.
    idx = jax.lax.broadcasted_iota(jnp.int32, (1, hw), 1)
    in_col = (idx % w) != (w - 1)                         # column c+1 exists
    in_row = idx < (h - 1) * w                            # row    r+1 exists

    r01 = jnp.roll(x, -1, axis=1)                         # x[i, r,   c+1] (pre-mask)
    r10 = jnp.roll(x, -w, axis=1)                         # x[i, r+1, c  ]
    r11 = jnp.roll(x, -(w + 1), axis=1)                   # x[i, r+1, c+1]

    x_stack = jnp.concatenate(
        [x,
         jnp.where(in_col, r01, 0.0),
         jnp.where(in_row, r10, 0.0),
         jnp.where(in_col & in_row, r11, 0.0)],
        axis=0)                                           # (4*Cin, HW)

    # Phase-stacked transposed conv as a single MXU dot:
    #   acc[(2a+b)*Cout + o, r*W + c] == conv_transpose(x)[o, 2r+a, 2c+b]
    acc = jnp.dot(a_ref[...].astype(jnp.float32), x_stack,
                  preferred_element_type=jnp.float32)     # (4*Cout, HW)
    # (bias omitted on purpose: it cancels exactly under InstanceNorm(affine=False))

    # InstanceNorm2d(affine=False, eps=1e-5) over all 4 phases per channel, fused stats.
    row_sum = jnp.sum(acc, axis=1, keepdims=True)         # (4*Cout, 1)
    row_sq = jnp.sum(acc * acc, axis=1, keepdims=True)    # (4*Cout, 1)
    ch_sum = (row_sum[0:cout] + row_sum[cout:2 * cout]
              + row_sum[2 * cout:3 * cout] + row_sum[3 * cout:4 * cout])
    ch_sq = (row_sq[0:cout] + row_sq[cout:2 * cout]
             + row_sq[2 * cout:3 * cout] + row_sq[3 * cout:4 * cout])
    inv_n = 1.0 / (4.0 * hw)                              # 4*HW == Ho*Wo elements/channel
    mean = ch_sum * inv_n                                 # (Cout, 1)
    var = jnp.maximum(ch_sq * inv_n - mean * mean, 0.0)
    scale = jax.lax.rsqrt(var + 1e-5)                     # (Cout, 1), EUP
    shift = mean * scale

    scale4 = jnp.concatenate([scale] * 4, axis=0)         # (4*Cout, 1)
    shift4 = jnp.concatenate([shift] * 4, axis=0)
    o_ref[0] = jnp.maximum(acc * scale4 - shift4, 0.0).astype(o_ref.dtype)


def _phase_weights(weight):
    """Phase-stacked weights for the stride-2, k=3, p=1, op=1 transposed conv.

    weight: PyTorch ConvTranspose2d weight, shape (Cin, Cout, 3, 3).
    Returns A with shape (4*Cout, 4*Cin) such that column block s = 2*dr + dc
    holds, at row (2*a + b)*Cout + o and column s*Cin + i,
      weight[i, o, a + 1 - 2*dr, b + 1 - 2*dc]
    (zero when the kernel index is outside [0, 3)).
    """
    cin, cout = weight.shape[0], weight.shape[1]
    wm = jnp.transpose(weight, (1, 0, 2, 3))              # (Cout, Cin, 3, 3)
    zero = jnp.zeros((cout, cin), weight.dtype)
    shifts = []
    for dr in (0, 1):
        for dc in (0, 1):
            rows = []
            for a in (0, 1):
                for b in (0, 1):
                    kh = a + 1 - 2 * dr
                    kw = b + 1 - 2 * dc
                    rows.append(wm[:, :, kh, kw] if (0 <= kh < 3 and 0 <= kw < 3) else zero)
            shifts.append(jnp.concatenate(rows, axis=0))  # (4*Cout, Cin)
    return jnp.concatenate(shifts, axis=1)                # (4*Cout, 4*Cin)


@functools.partial(jax.jit, static_argnames=("stride",))
def g_upsampling_block(x, weight, bias=None, stride=2):
    """x: (N, Cin, H, W); weight: (Cin, Cout, 3, 3) (PyTorch ConvTranspose2d layout);
    bias: (Cout,) accepted for API parity but unused — InstanceNorm(affine=False)
    subtracts the per-channel mean, so a per-channel bias cancels exactly."""
    del bias
    if stride != 2:
        raise NotImplementedError("phase decomposition specialized for stride=2, output_padding=1")
    n, cin, h, w = x.shape
    cout = weight.shape[1]
    hw = h * w

    a_mat = _phase_weights(weight)          # (4*Cout, 4*Cin)
    x_flat = x.reshape(n, cin, hw)          # free reshape -> lane-dense input slab

    kernel = functools.partial(_gupsample_kernel, h=h, w=w, cout=cout)
    out = pl.pallas_call(
        kernel,
        out_shape=jax.ShapeDtypeStruct((n, 4 * cout, hw), jnp.float32),
        grid_spec=pltpu.PrefetchScalarGridSpec(
            num_scalar_prefetch=0,
            grid=(n,),
            in_specs=[
                pl.BlockSpec((1, cin, hw), lambda i: (i, 0, 0)),
                pl.BlockSpec((4 * cout, 4 * cin), lambda i: (0, 0)),
            ],
            out_specs=pl.BlockSpec((1, 4 * cout, hw), lambda i: (i, 0, 0)),
        ),
        compiler_params=pltpu.CompilerParams(dimension_semantics=("parallel",)),
    )(x_flat, a_mat)

    # Interleave the 4 output phases back to NCHW:
    #   out[n, (2a+b)*Cout + o, r*W + c]  ->  y[n, o, 2r+a, 2c+b]
    y = out.reshape(n, 2, 2, cout, h, w)          # (n, a, b, o, r, c)
    y = jnp.transpose(y, (0, 3, 4, 1, 5, 2))      # (n, o, r, a, c, b)
    return y.reshape(n, cout, 2 * h, 2 * w)


def _reference(x, weight, bias, stride=2):
    """Pure-JAX reference matching PyTorch semantics (bias included to show it cancels)."""
    cout = weight.shape[1]
    k, p, op = 3, 1, 1
    pad_lo = k - 1 - p
    pad_hi = k - 1 - p + op
    wflip = jnp.transpose(weight, (1, 0, 2, 3))[:, :, ::-1, ::-1]
    conv = jax.lax.conv_general_dilated(
        x, wflip, window_strides=(1, 1),
        padding=[(pad_lo, pad_hi), (pad_lo, pad_hi)],
        lhs_dilation=(stride, stride),
        dimension_numbers=("NCHW", "OIHW", "NCHW"),
    ) + bias.reshape(1, cout, 1, 1)
    mean = conv.mean(axis=(2, 3), keepdims=True)
    var = jnp.square(conv - mean).mean(axis=(2, 3), keepdims=True)
    return jnp.maximum((conv - mean) * jax.lax.rsqrt(var + 1e-5), 0.0)


if __name__ == "__main__":
    key = jax.random.PRNGKey(0)
    kx, kw_, kb = jax.random.split(key, 3)
    N, CIN, COUT, H, W, STRIDE = 2, 4, 8, 16, 16, 2

    x = jax.random.normal(kx, (N, CIN, H, W), dtype=jnp.float32)
    # PyTorch ConvTranspose2d weight shape: (in_channels, out_channels, kH, kW)
    weight = jax.random.normal(kw_, (CIN, COUT, 3, 3), dtype=jnp.float32) * 0.1
    bias = jax.random.normal(kb, (COUT,), dtype=jnp.float32) * 0.1

    out = g_upsampling_block(x, weight, bias, stride=STRIDE)
    out = jax.block_until_ready(out)
    assert out.shape == (N, COUT, 2 * H, 2 * W), out.shape

    ref = _reference(x, weight, bias, stride=STRIDE)
    err = float(jnp.max(jnp.abs(out - ref)))
    assert jnp.allclose(out, ref, atol=1e-2, rtol=1e-2), err

    print("KERNEL_OK")
</pallas_src>

<mosaic_0001>
module attributes {stable_mosaic.version = 11 : i64} {
  func.func @_gupsample_kernel(%arg0: i32, %arg1: memref<1x4x256xf32, #tpu.memory_space<vmem>>, %arg2: memref<32x16xf32, #tpu.memory_space<vmem>>, %arg3: memref<1x32x256xf32, #tpu.memory_space<vmem>>) attributes {dimension_semantics = [#tpu.dimension_semantics<parallel>], iteration_bounds = array<i64: 2>, scalar_prefetch = 0 : i64, scratch_operands = 0 : i64, tpu.core_type = #tpu.core_type<tc>, window_params = [{transform_indices = @transform_0, window_bounds = array<i64: 1, 4, 256>}, {pipeline_mode = #tpu.pipeline_mode<synchronous>, transform_indices = @transform_1, window_bounds = array<i64: 32, 16>}, {transform_indices = @transform_2, window_bounds = array<i64: 1, 32, 256>}]} {
    %c0 = arith.constant 0 : index
    %c0_0 = arith.constant 0 : index
    %c0_1 = arith.constant 0 : index
    %0 = vector.load %arg1[%c0, %c0_0, %c0_1] : memref<1x4x256xf32, #tpu.memory_space<vmem>>, vector<1x4x256xf32>
    %1 = vector.shape_cast %0 : vector<1x4x256xf32> to vector<4x256xf32>
    %2 = tpu.iota {dimensions = array<i32: 1>} : vector<1x256xi32>
    %c16_i32 = arith.constant 16 : i32
    %c0_i32 = arith.constant 0 : i32
    %3 = arith.cmpi eq, %c16_i32, %c0_i32 : i32
    %c1_i32 = arith.constant 1 : i32
    %4 = arith.select %3, %c1_i32, %c16_i32 : i32
    %5 = vector.broadcast %4 : i32 to vector<1x256xi32>
    %6 = arith.remsi %2, %5 : vector<1x256xi32>
    %c0_i32_2 = arith.constant 0 : i32
    %7 = vector.broadcast %c0_i32_2 : i32 to vector<1x256xi32>
    %8 = arith.cmpi ne, %6, %7 : vector<1x256xi32>
    %c0_i32_3 = arith.constant 0 : i32
    %9 = vector.broadcast %c0_i32_3 : i32 to vector<1x256xi32>
    %10 = arith.cmpi slt, %6, %9 : vector<1x256xi32>
    %c0_i32_4 = arith.constant 0 : i32
    %11 = arith.cmpi slt, %4, %c0_i32_4 : i32
    %12 = vector.broadcast %11 : i1 to vector<1x256xi1>
    %13 = vector.broadcast %12 : vector<1x256xi1> to vector<1x256xi1>
    %14 = arith.xori %10, %13 : vector<1x256xi1>
    %15 = arith.andi %14, %8 : vector<1x256xi1>
    %16 = vector.broadcast %4 : i32 to vector<1x256xi32>
    %17 = arith.addi %6, %16 : vector<1x256xi32>
    %18 = arith.select %15, %17, %6 : vector<1x256xi1>, vector<1x256xi32>
    %c15_i32 = arith.constant 15 : i32
    %19 = vector.broadcast %c15_i32 : i32 to vector<1x256xi32>
    %20 = arith.cmpi ne, %18, %19 : vector<1x256xi32>
    %c240_i32 = arith.constant 240 : i32
    %21 = vector.broadcast %c240_i32 : i32 to vector<1x256xi32>
    %22 = arith.cmpi slt, %2, %21 : vector<1x256xi32>
    %23 = vector.extract_strided_slice %1 {offsets = [0, 1], sizes = [4, 255], strides = [1, 1]} : vector<4x256xf32> to vector<4x255xf32>
    %24 = vector.extract_strided_slice %1 {offsets = [0, 0], sizes = [4, 1], strides = [1, 1]} : vector<4x256xf32> to vector<4x1xf32>
    %25 = tpu.concatenate %23, %24 in 1 : vector<4x255xf32>, vector<4x1xf32> -> vector<4x256xf32>
    %26 = vector.extract_strided_slice %1 {offsets = [0, 16], sizes = [4, 240], strides = [1, 1]} : vector<4x256xf32> to vector<4x240xf32>
    %27 = vector.extract_strided_slice %1 {offsets = [0, 0], sizes = [4, 16], strides = [1, 1]} : vector<4x256xf32> to vector<4x16xf32>
    %28 = tpu.concatenate %26, %27 in 1 : vector<4x240xf32>, vector<4x16xf32> -> vector<4x256xf32>
    %29 = vector.extract_strided_slice %1 {offsets = [0, 17], sizes = [4, 239], strides = [1, 1]} : vector<4x256xf32> to vector<4x239xf32>
    %30 = vector.extract_strided_slice %1 {offsets = [0, 0], sizes = [4, 17], strides = [1, 1]} : vector<4x256xf32> to vector<4x17xf32>
    %31 = tpu.concatenate %29, %30 in 1 : vector<4x239xf32>, vector<4x17xf32> -> vector<4x256xf32>
    %cst = arith.constant 0.000000e+00 : f32
    %32 = vector.shape_cast %20 : vector<1x256xi1> to vector<1x256xi1>
    %33 = vector.broadcast %32 : vector<1x256xi1> to vector<4x256xi1>
    %34 = vector.broadcast %cst : f32 to vector<4x256xf32>
    %35 = arith.select %33, %25, %34 : vector<4x256xi1>, vector<4x256xf32>
    %cst_5 = arith.constant 0.000000e+00 : f32
    %36 = vector.shape_cast %22 : vector<1x256xi1> to vector<1x256xi1>
    %37 = vector.broadcast %36 : vector<1x256xi1> to vector<4x256xi1>
    %38 = vector.broadcast %cst_5 : f32 to vector<4x256xf32>
    %39 = arith.select %37, %28, %38 : vector<4x256xi1>, vector<4x256xf32>
    %40 = arith.andi %20, %22 : vector<1x256xi1>
    %cst_6 = arith.constant 0.000000e+00 : f32
    %41 = vector.shape_cast %40 : vector<1x256xi1> to vector<1x256xi1>
    %42 = vector.broadcast %41 : vector<1x256xi1> to vector<4x256xi1>
    %43 = vector.broadcast %cst_6 : f32 to vector<4x256xf32>
    %44 = arith.select %42, %31, %43 : vector<4x256xi1>, vector<4x256xf32>
    %45 = tpu.concatenate %1, %35, %39, %44 in 0 : vector<4x256xf32>, vector<4x256xf32>, vector<4x256xf32>, vector<4x256xf32> -> vector<16x256xf32>
    %c0_7 = arith.constant 0 : index
    %c0_8 = arith.constant 0 : index
    %46 = vector.load %arg2[%c0_7, %c0_8] : memref<32x16xf32, #tpu.memory_space<vmem>>, vector<32x16xf32>
    %cst_9 = arith.constant dense<0.000000e+00> : vector<32x256xf32>
    %47 = tpu.matmul %46, %45, %cst_9 {dimension_numbers = #tpu.dot_dimension_numbers<[1], [0], [0], [1], [0, 0, 1, 1], [], []>} : vector<32x16xf32>, vector<16x256xf32>, vector<32x256xf32> -> vector<32x256xf32>
    %cst_10 = arith.constant dense<0.000000e+00> : vector<32xf32>
    %48 = vector.multi_reduction <add>, %47, %cst_10 [1] : vector<32x256xf32> to vector<32xf32>
    %49 = vector.shape_cast %48 : vector<32xf32> to vector<32x1xf32>
    %50 = arith.mulf %47, %47 : vector<32x256xf32>
    %cst_11 = arith.constant dense<0.000000e+00> : vector<32xf32>
    %51 = vector.multi_reduction <add>, %50, %cst_11 [1] : vector<32x256xf32> to vector<32xf32>
    %52 = vector.shape_cast %51 : vector<32xf32> to vector<32x1xf32>
    %53 = vector.extract_strided_slice %49 {offsets = [0, 0], sizes = [8, 1], strides = [1, 1]} : vector<32x1xf32> to vector<8x1xf32>
    %54 = vector.extract_strided_slice %49 {offsets = [8, 0], sizes = [8, 1], strides = [1, 1]} : vector<32x1xf32> to vector<8x1xf32>
    %55 = arith.addf %53, %54 : vector<8x1xf32>
    %56 = vector.extract_strided_slice %49 {offsets = [16, 0], sizes = [8, 1], strides = [1, 1]} : vector<32x1xf32> to vector<8x1xf32>
    %57 = arith.addf %55, %56 : vector<8x1xf32>
    %58 = vector.extract_strided_slice %49 {offsets = [24, 0], sizes = [8, 1], strides = [1, 1]} : vector<32x1xf32> to vector<8x1xf32>
    %59 = arith.addf %57, %58 : vector<8x1xf32>
    %60 = vector.extract_strided_slice %52 {offsets = [0, 0], sizes = [8, 1], strides = [1, 1]} : vector<32x1xf32> to vector<8x1xf32>
    %61 = vector.extract_strided_slice %52 {offsets = [8, 0], sizes = [8, 1], strides = [1, 1]} : vector<32x1xf32> to vector<8x1xf32>
    %62 = arith.addf %60, %61 : vector<8x1xf32>
    %63 = vector.extract_strided_slice %52 {offsets = [16, 0], sizes = [8, 1], strides = [1, 1]} : vector<32x1xf32> to vector<8x1xf32>
    %64 = arith.addf %62, %63 : vector<8x1xf32>
    %65 = vector.extract_strided_slice %52 {offsets = [24, 0], sizes = [8, 1], strides = [1, 1]} : vector<32x1xf32> to vector<8x1xf32>
    %66 = arith.addf %64, %65 : vector<8x1xf32>
    %cst_12 = arith.constant 9.765625E-4 : f32
    %67 = vector.broadcast %cst_12 : f32 to vector<8x1xf32>
    %68 = arith.mulf %59, %67 : vector<8x1xf32>
    %cst_13 = arith.constant 9.765625E-4 : f32
    %69 = vector.broadcast %cst_13 : f32 to vector<8x1xf32>
    %70 = arith.mulf %66, %69 : vector<8x1xf32>
    %71 = arith.mulf %68, %68 : vector<8x1xf32>
    %72 = arith.subf %70, %71 : vector<8x1xf32>
    %cst_14 = arith.constant 0.000000e+00 : f32
    %73 = vector.broadcast %cst_14 : f32 to vector<8x1xf32>
    %74 = arith.maximumf %72, %73 : vector<8x1xf32>
    %cst_15 = arith.constant 9.99999974E-6 : f32
    %75 = vector.broadcast %cst_15 : f32 to vector<8x1xf32>
    %76 = arith.addf %74, %75 : vector<8x1xf32>
    %77 = math.rsqrt %76 : vector<8x1xf32>
    %78 = arith.mulf %68, %77 : vector<8x1xf32>
    %79 = tpu.concatenate %77, %77, %77, %77 in 0 : vector<8x1xf32>, vector<8x1xf32>, vector<8x1xf32>, vector<8x1xf32> -> vector<32x1xf32>
    %80 = tpu.concatenate %78, %78, %78, %78 in 0 : vector<8x1xf32>, vector<8x1xf32>, vector<8x1xf32>, vector<8x1xf32> -> vector<32x1xf32>
    %81 = vector.broadcast %79 : vector<32x1xf32> to vector<32x256xf32>
    %82 = arith.mulf %47, %81 : vector<32x256xf32>
    %83 = vector.broadcast %80 : vector<32x1xf32> to vector<32x256xf32>
    %84 = arith.subf %82, %83 : vector<32x256xf32>
    %cst_16 = arith.constant 0.000000e+00 : f32
    %85 = vector.broadcast %cst_16 : f32 to vector<32x256xf32>
    %86 = arith.maximumf %84, %85 : vector<32x256xf32>
    %c0_17 = arith.constant 0 : index
    %c0_18 = arith.constant 0 : index
    %c0_19 = arith.constant 0 : index
    %87 = vector.load %arg3[%c0_17, %c0_18, %c0_19] : memref<1x32x256xf32, #tpu.memory_space<vmem>>, vector<1x32x256xf32>
    %88 = vector.shape_cast %87 : vector<1x32x256xf32> to vector<32x256xf32>
    %89 = vector.shape_cast %86 : vector<32x256xf32> to vector<1x32x256xf32>
    tpu.vector_store %arg3[%c0_17, %c0_18, %c0_19], %89 {strides = array<i32>} : memref<1x32x256xf32, #tpu.memory_space<vmem>>, vector<1x32x256xf32>,
    return
  }
  func.func @transform_0(%arg0: i32) -> (i32, i32, i32) {
    %c0_i32 = arith.constant 0 : i32
    %c0_i32_0 = arith.constant 0 : i32
    %c0_i32_1 = arith.constant 0 : i32
    return %arg0, %c0_i32, %c0_i32_0 : i32, i32, i32
  }
  func.func @transform_1(%arg0: i32) -> (i32, i32) {
    %c0_i32 = arith.constant 0 : i32
    %c0_i32_0 = arith.constant 0 : i32
    %c0_i32_1 = arith.constant 0 : i32
    return %c0_i32, %c0_i32_0 : i32, i32
  }
  func.func @transform_2(%arg0: i32) -> (i32, i32, i32) {
    %c0_i32 = arith.constant 0 : i32
    %c0_i32_0 = arith.constant 0 : i32
    %c0_i32_1 = arith.constant 0 : i32
    return %arg0, %c0_i32, %c0_i32_0 : i32, i32, i32
  }
}

</mosaic_0001>

<bundles_post_ra>
// kernel: g_upsampling_block.1
= control target key start
LH: loop header
LB: loop body
LE: loop exit
PB: predicated region body
PF: predicated region fallthrough
CT: control target
= control target key end

     0   :  { %s562_s9 = smov 0   ;;  %s635_s0 = inlined_call_operand.vmem [shape: f32[2,4,256], index: 0, kind: input, shape index: {}]   ;;  %s636_s1 = inlined_call_operand.vmem [shape: f32[32,16], index: 1, kind: input, shape index: {}]   ;;  %s637_s2 = inlined_call_operand.vmem [shape: f32[2,32,256], index: 2, kind: output, shape index: {}]  }
   0x1 LB: > { %s495_s10 = sadd.s32 4294967295, %s540_s9   ;;  %p499_p0 = scmp.ge.s32.totalorder %s540_s9, 1  ;;  %s540_s9 = sphi %s562_s9, %s12_s9  }
   0x2   : > { %p112_p1 = scmp.lt.s32.totalorder %s540_s9, 3 }
   0x4   : > { %p113_p2 = pnand %p499_p0, %p112_p1 }
   0x5   : > { %p134_p3 = scmp.lt.s32.totalorder (!%p113_p2), %s495_s10, 1  ;;  %s542_s15 = smov (!%p113_p2), 127  }
   0x6   : > { %116 = sbr.rel (%p113_p2) target bundleno = 654 (0x28e), region = 28  ;;  %s543_s16 = smov (!%p113_p2), 111  }
   0x7   : > { %s545_s17 = smov (!%p113_p2), 112  }
   0xb   : > { %s645_s10 = smov (!%p134_p3, %s495_s10), 1  ;;  %v544_v2 = vmov 0.0   ;;  %v145_v3 = vlaneseq  ;;  %vm182_vm2 = vcmask 1039360   ;;  %vm202_vm3 = vcmask 908288   ;;  %v246_v35 = vld [vmem:[%s636_s1] sm:$0xff]  ;;  %v248_v36 = vld [vmem:[%s636_s1 + $0x10] sm:$0xff] }
   0xc   : > { %s510_s11 = sshll.u32 %s645_s10, 3  ;;  %327 = vmatprep.mubr.f32.mxu0 %v544_v2  ;;  %339 = vmatprep.mubr.f32.mxu1 %v544_v2  ;;  %vm192_vm6 = vcmask 916480   ;;  %vm241_vm7 = vcmask 1043456   ;;  %vm250_vm8 = vcmask 130048   ;;  %v247_v38 = vld [vmem:[%s636_s1 + $0x8] sm:$0xff]  ;;  %v249_v39 = vld [vmem:[%s636_s1 + $0x18] sm:$0xff] }
   0xd   : > { %s138_s14 = scalar_lea.vmem %s635_s0, %s510_s11  ;;  %v146_v4 = vand.u32 127, %v145_v3  ;;  %s511_s26 = sshll.u32 %s645_s10, 6 }
   0xe   : > { %v144_v0 = vld [vmem:[%s138_s14] sm:$0xff]  ;;  %s143_s29 = scalar_lea.vmem %s637_s2, %s511_s26 }
   0xf   : > { %178 = vrot.lane.b32.xlu1 %v144_v0, %s542_s15  ;;  %198 = vrot.lane.b32.xlu0 %v144_v0, %s543_s16  ;;  %v177_v1 = vcombine.high %v144_v0, %v144_v0  ;;  %v147_v5 = vadd.s32 128, %v146_v4  ;;  %v152_v7 = vand.u32 15, %v146_v4 }
  0x11   : > { %v159_v6 = vand.u32 15, %v147_v5  ;;  %vm175_vm1 = vcmp.lt.s32.totalorder %v147_v5, 240  ;;  %vm580_vm4 = vcmp.ne.s32.totalorder %v152_v7, 15 }
  0x13   : > { %180 = vrot.lane.b32.xlu1 %v177_v1, %s542_s15  ;;  %200 = vrot.lane.b32.xlu0 %v177_v1, %s543_s16  ;;  %vm576_vm0 = vcmp.ne.s32.totalorder %v159_v6, 15 }
  0x14   : > { %vm587_vm5 = vmand %vm576_vm0, %vm175_vm1 }
  0x17   : > { %190 = vrot.lane.b32.xlu1 %v177_v1, %s545_s17  ;;  %188 = vrot.lane.b32.xlu0 %v144_v0, %s545_s17 }
  0x81   : > { %v179_v8 = vpop.permute.xlu1 %178  ;;  %v199_v9 = vpop.permute.xlu0 %198 }
  0x85   : > { %v181_v13 = vpop.permute.xlu1 %180  ;;  %v201_v14 = vpop.permute.xlu0 %200 }
  0x86   : > { %v183_v15 = vsel %vm182_vm2, %v179_v8, %v181_v13  ;;  %v187_v16 = vsel %vm182_vm2, %v181_v13, %v179_v8  ;;  %v203_v17 = vsel %vm202_vm3, %v199_v9, %v201_v14  ;;  %v207_v18 = vsel %vm202_vm3, %v201_v14, %v199_v9 }
  0x87   : > { %v213_v19 = vsel %vm576_vm0, %v187_v16, 0.0  ;;  %v226_v20 = vsel %vm580_vm4, %v203_v17, 0.0  ;;  %v227_v21 = vsel %vm587_vm5, %v207_v18, 0.0  ;;  %v212_v22 = vsel %vm580_vm4, %v183_v15, 0.0 }
  0x88   : > { %v237_v23 = vrot.slane %v226_v20, 4  ;;  %v232_v26 = vrot.slane %v213_v19, 4  ;;  %v238_v27 = vrot.slane %v227_v21, 4  ;;  %v231_v30 = vrot.slane %v212_v22, 4 }
  0x89   : > { %v191_v24 = vpop.permute.xlu1 %190  ;;  %v189_v25 = vpop.permute.xlu0 %188 }
  0x8a   : > { %v193_v28 = vsel %vm192_vm6, %v189_v25, %v191_v24  ;;  %v197_v29 = vsel %vm192_vm6, %v191_v24, %v189_v25  ;;  %v243_v34 = vsel %vm241_vm7, %v177_v1, %v232_v26  ;;  %v242_v37 = vsel %vm241_vm7, %v144_v0, %v231_v30 }
  0x8b   : > { %v219_v31 = vsel %vm175_vm1, %v197_v29, 0.0  ;;  %v244_v33 = vsel %vm241_vm7, %v193_v28, %v237_v23  ;;  %v546_v0 = vmov 0  }
  0x8c   : > { %v245_v32 = vsel %vm241_vm7, %v219_v31, %v238_v27  ;;  %529 = vset.pattern.permute.xlu1 %v546_v0  ;;  %530 = vset.pattern.permute.xlu0 %v546_v0 }
  0x8d   : > { %291 = vmatprep.subr.mxu0 %v245_v32  ;;  %512 = vmatprep.subr.mxu1 %v245_v32 }
  0x8e   : > { %292 = vmatpush1.msra.mxu0 %v244_v33  ;;  %514 = vmatpush1.msra.mxu1 %v244_v33 }
  0x8f   : > { %293 = vmatprep.subr.mxu0 %v243_v34  ;;  %513 = vmatprep.subr.mxu1 %v243_v34 }
  0x90   : > { %294 = vmatpush1.msra.mxu0 %v242_v37  ;;  %515 = vmatpush1.msra.mxu1 %v242_v37 }
  0x91   : > { %504 = vmatmul.mubr.msk.f32.vlgmr.msra.gmra.mxu0 %vm250_vm8, %v246_v35  ;;  %506 = vmatmul.mubr.msk.f32.vlgmr.msra.gmra.mxu1 %vm250_vm8, %v248_v36 }
  0x92   : > { %333 = vmatprep.mubr.f32.mxu0 %v544_v2  ;;  %345 = vmatprep.mubr.f32.mxu1 %v544_v2 }
  0x95   : > { %505 = vmatmul.mubr.msk.f32.gmra.mxu0 %vm250_vm8, %v247_v38  ;;  %507 = vmatmul.mubr.msk.f32.gmra.mxu1 %vm250_vm8, %v249_v39 }
 0x151   : > { %v329_v40 = vpop.f32.mrf.mxu0  ;;  %v616_v41 = vpop.f32.mrf.mxu1 }
 0x152   : > { %v364_v53 = vmul.f32 %v329_v40, %v329_v40  ;;  %v368_v56 = vmul.f32 %v616_v41, %v616_v41 }
 0x153   : > { %v331_v42 = vpop.f32.mrf.mxu0  ;;  %v618_v43 = vpop.f32.mrf.mxu1 }
 0x154   : > { %v352_v44 = vadd.f32 %v331_v42, %v329_v40  ;;  %v358_v47 = vadd.f32 %v618_v43, %v616_v41  ;;  %v365_v50 = vmul.f32 %v331_v42, %v331_v42  ;;  %v369_v57 = vmul.f32 %v618_v43, %v618_v43 }
 0x155   : > { %v335_v45 = vpop.f32.mrf.mxu0  ;;  %v347_v52 = vpop.f32.mrf.mxu1 }
 0x156   : > { %353 = vadd.xlane.f32.xlu0 %v352_v44  ;;  %v366_v51 = vmul.f32 %v335_v45, %v335_v45  ;;  %v372_v54 = vadd.f32 %v365_v50, %v364_v53  ;;  %v378_v61 = vadd.f32 %v369_v57, %v368_v56  ;;  %v370_v62 = vmul.f32 %v347_v52, %v347_v52 }
 0x157   : > { %v337_v46 = vpop.f32.mrf.mxu0  ;;  %v349_v58 = vpop.f32.mrf.mxu1 }
 0x158   : > { %v367_v48 = vmul.f32 %v337_v46, %v337_v46  ;;  %v355_v49 = vadd.f32 %v337_v46, %v335_v45  ;;  %v371_v59 = vmul.f32 %v349_v58, %v349_v58  ;;  %v361_v60 = vadd.f32 %v349_v58, %v347_v52 }
 0x15a   : > { %359 = vadd.xlane.f32.xlu0 %v358_v47  ;;  %356 = vadd.xlane.f32.xlu1 %v355_v49  ;;  %v375_v55 = vadd.f32 %v367_v48, %v366_v51  ;;  %v381_v63 = vadd.f32 %v371_v59, %v370_v62 }
 0x15e   : > { %373 = vadd.xlane.f32.xlu0 %v372_v54  ;;  %376 = vadd.xlane.f32.xlu1 %v375_v55 }
 0x162   : > { %362 = vadd.xlane.f32.xlu0 %v361_v60  ;;  %379 = vadd.xlane.f32.xlu1 %v378_v61 }
 0x166   : > { %382 = vadd.xlane.f32.xlu0 %v381_v63 }
 0x1df   : > { %v354_v1 = vpop.xlane.xlu0 %353 }
 0x1e3   : > { %v360_v2 = vpop.xlane.xlu0 %359  ;;  %v357_v3 = vpop.xlane.xlu1 %356 }
 0x1e4   : > { %v384_v4 = vadd.f32 %v357_v3, %v354_v1 }
 0x1e6   : > { %v385_v7 = vadd.f32 %v384_v4, %v360_v2 }
 0x1e7   : > { %v374_v5 = vpop.xlane.xlu0 %373  ;;  %v377_v6 = vpop.xlane.xlu1 %376 }
 0x1e8   : > { %v387_v10 = vadd.f32 %v377_v6, %v374_v5 }
 0x1eb   : > { %v363_v8 = vpop.xlane.xlu0 %362  ;;  %v380_v9 = vpop.xlane.xlu1 %379 }
 0x1ec   : > { %v386_v11 = vadd.f32 %v385_v7, %v363_v8  ;;  %v388_v13 = vadd.f32 %v387_v10, %v380_v9 }
 0x1ee   : > { %v390_v12 = vmul.f32 0.0009765625, %v386_v11 }
 0x1ef   : > { %v383_v14 = vpop.xlane.xlu0 %382 }
 0x1f0   : > { %v389_v15 = vadd.f32 %v388_v13, %v383_v14  ;;  %v392_v16 = vmul.f32 %v390_v12, %v390_v12 }
 0x1f2   : > { %v391_v17 = vmul.f32 0.0009765625, %v389_v15 }
 0x1f4   : > { %v393_v18 = vsub.f32 %v391_v17, %v392_v16 }
 0x1f6   : > { %v394_v19 = vmax.f32 %v393_v18, 0.0 }
 0x1f8   : > { %v395_v20 = vadd.f32 1e-05, %v394_v19 }
 0x1fa   : > { %532 = vrsqrt.f32 %v395_v20 }
 0x207   : > { %v533_v21 = vpop.eup %532 }
 0x208   : > { %400 = vperm.xlu1 %529, %v533_v21   ;;  %v397_v22 = vmul.f32 %v533_v21, %v390_v12 }
 0x20a   : > { %413 = vperm.xlu0 %530, %v397_v22  }
 0x283   : > { %v401_v23 = vpop.permute.xlu1 %400 }
 0x284   : > { %v403_v24 = vmul.f32 %v401_v23, %v329_v40  ;;  %v404_v25 = vmul.f32 %v401_v23, %v331_v42  ;;  %v405_v26 = vmul.f32 %v401_v23, %v335_v45  ;;  %v406_v27 = vmul.f32 %v401_v23, %v337_v46 }
 0x285   : > { %v407_v28 = vmul.f32 %v401_v23, %v616_v41  ;;  %v408_v29 = vmul.f32 %v401_v23, %v618_v43  ;;  %v409_v30 = vmul.f32 %v401_v23, %v347_v52  ;;  %v410_v31 = vmul.f32 %v401_v23, %v349_v58  ;;  %v414_v32 = vpop.permute.xlu0 %413 }
 0x286   : > { %v416_v33 = vsub.f32 %v403_v24, %v414_v32  ;;  %v417_v34 = vsub.f32 %v404_v25, %v414_v32  ;;  %v418_v35 = vsub.f32 %v405_v26, %v414_v32  ;;  %v419_v36 = vsub.f32 %v406_v27, %v414_v32 }
 0x287   : > { %v420_v37 = vsub.f32 %v407_v28, %v414_v32  ;;  %v421_v38 = vsub.f32 %v408_v29, %v414_v32  ;;  %v422_v39 = vsub.f32 %v409_v30, %v414_v32  ;;  %v423_v40 = vsub.f32 %v410_v31, %v414_v32 }
 0x288   : > { %v424_v42 = vmax.f32 %v416_v33, 0.0  ;;  %v425_v44 = vmax.f32 %v417_v34, 0.0  ;;  %v426_v41 = vmax.f32 %v418_v35, 0.0  ;;  %v427_v45 = vmax.f32 %v419_v36, 0.0 }
 0x289   : > { %v428_v43 = vmax.f32 %v420_v37, 0.0  ;;  %v429_v46 = vmax.f32 %v421_v38, 0.0  ;;  %v430_v47 = vmax.f32 %v422_v39, 0.0  ;;  %v431_v48 = vmax.f32 %v423_v40, 0.0 }
 0x28a   : > { %432 = vst [vmem:[%s143_s29] sm:$0xff] %v424_v42  ;;  %433 = vst [vmem:[%s143_s29 + $0x8] sm:$0xff] %v425_v44 }
 0x28b   : > { %434 = vst [vmem:[%s143_s29 + $0x10] sm:$0xff] %v426_v41  ;;  %435 = vst [vmem:[%s143_s29 + $0x18] sm:$0xff] %v427_v45 }
 0x28c   : > { %436 = vst [vmem:[%s143_s29 + $0x20] sm:$0xff] %v428_v43  ;;  %437 = vst [vmem:[%s143_s29 + $0x28] sm:$0xff] %v429_v46 }
 0x28d   : > { %438 = vst [vmem:[%s143_s29 + $0x30] sm:$0xff] %v430_v47  ;;  %439 = vst [vmem:[%s143_s29 + $0x38] sm:$0xff] %v431_v48 }
 0x28e PF: > { %s12_s9 = sadd.s32 1, %s540_s9  }
 0x28f   : > { %p9_p4 = scmp.ge.s32.totalorder %s12_s9, 4  }
 0x291   :  { %11 = sbr.rel (!%p9_p4) target bundleno = 1 (0x1), region = 58 }

</bundles_post_ra>
